<compile_context>
chip_gen: v6e
topology: v6e:2x2x1
jax: 0.10.0
libtpu: 0.0.40
codegen_flags: <defaults>
</compile_context>

<pallas_src>
import functools

import jax
import jax.numpy as jnp
from jax import lax
from jax.experimental import pallas as pl
from jax.experimental.pallas import tpu as pltpu


def _ceil_to(x, m):
    return -(-x // m) * m


def _num_tensorcores():
    """Best-effort TensorCores-per-device (v7x = 2; v4/v5p megacore = 2; else 1)."""
    try:
        kind = (getattr(jax.devices()[0], "device_kind", "") or "").lower()
    except Exception:
        return 1
    if "v7" in kind or "v4" in kind or "v5p" in kind:
        return 2
    return 1


def _jacobi_kan_kernel(x_ref, w_ref, gamma_ref, beta_ref, o_ref, *,
                       degree, a, b, eps, out_true):
    # x_ref:     (TB, I)                 input tile (any float dtype)
    # w_ref:     ((degree+1)*I, O_pad)   degree-major packed coefficients (bf16)
    # gamma_ref: (1, O_pad) f32          zero in padded lanes
    # beta_ref:  (1, O_pad) f32          zero in padded lanes
    # o_ref:     (TB, O_cols)            O_cols == out_true (compact) or O_pad

    # f32 tanh / recurrence (v5e VPU/EUP have no bf16 path).
    x = jnp.tanh(x_ref[...].astype(jnp.float32))                     # (TB, I)

    # Jacobi recurrence, all terms kept in vregs -- no VMEM slab round-trip.
    polys = [jnp.ones_like(x)]
    if degree > 0:
        polys.append((a - b + (a + b + 2.0) * x) * 0.5)
    for i in range(2, degree + 1):
        theta_k = (2 * i + a + b) * (2 * i + a + b - 1) / (2 * i * (i + a + b))
        theta_k1 = ((2 * i + a + b - 1) * (a * a - b * b)
                    / (2 * i * (i + a + b) * (2 * i + a + b - 2)))
        theta_k2 = ((i + a - 1) * (i + b - 1) * (2 * i + a + b)
                    / (i * (i + a + b) * (2 * i + a + b - 2)))
        polys.append((theta_k * x + theta_k1) * polys[-1] - theta_k2 * polys[-2])

    # Degree axis fused into one MXU matmul over K = (degree+1)*I.  Lane-concat
    # (XLU slot has slack), cast operands to the coefficient dtype (bf16 ->
    # native MXU path), accumulate in f32.
    lhs = jnp.concatenate(polys, axis=-1).astype(w_ref.dtype)        # (TB, (D+1)*I)
    acc = jnp.dot(lhs, w_ref[...], preferred_element_type=jnp.float32)  # (TB, O_pad)

    # LayerNorm over the TRUE output features.  Padded lanes of `acc` are
    # exactly zero (padded coefficient columns are zero), so one-pass stats
    # over all O_pad lanes divided by out_true are exact.
    inv_o = 1.0 / float(out_true)
    s = jnp.sum(acc, axis=-1, keepdims=True)
    ss = jnp.sum(acc * acc, axis=-1, keepdims=True)
    mean = s * inv_o
    var = jnp.maximum(ss * inv_o - mean * mean, 0.0)   # guard negative excursion
    y = (acc - mean) * lax.rsqrt(var + eps)
    y = y * gamma_ref[...] + beta_ref[...]

    # Compact store: only the real output columns (removes the 4x padded HBM
    # write and the post-call slice copy).  If o_ref is the padded layout this
    # slice is a no-op.
    o_ref[...] = y[:, :o_ref.shape[1]].astype(o_ref.dtype)


def prepare_jacobi_kan_params(jacobi_coeffs, gamma, beta, *, lane_multiple=128,
                              weight_dtype=jnp.bfloat16):
    """One-time parameter packing (do this OUTSIDE the per-call forward).

    jacobi_coeffs: (input_dim, output_dim, degree+1)  -- PyTorch layout.
    Returns dict with:
      w:     ((degree+1)*input_dim, O_pad)  degree-major packed, zero-padded on O,
             cast to `weight_dtype` (bf16 default -> native MXU path).
      gamma: (1, O_pad) f32, zero-padded
      beta:  (1, O_pad) f32, zero-padded

    NOTE: padded O columns MUST stay exactly zero -- the in-kernel LayerNorm
    statistics rely on it.  lane_multiple=128 is right for v5e; 256 only pays
    off on v6e/v7x once the layer is big enough to be MXU-bound.
    """
    input_dim, output_dim, dp1 = jacobi_coeffs.shape
    o_pad = _ceil_to(output_dim, lane_multiple)
    # (I, O, D+1) -> (D+1, I, O) -> ((D+1)*I, O): degree-major contraction axis,
    # matching the in-kernel slab layout [P_0 | P_1 | ... | P_D].
    w = jnp.transpose(jacobi_coeffs, (2, 0, 1)).reshape(dp1 * input_dim, output_dim)
    w = jnp.pad(w, ((0, 0), (0, o_pad - output_dim))).astype(weight_dtype)
    gamma2 = jnp.pad(jnp.reshape(gamma.astype(jnp.float32), (1, output_dim)),
                     ((0, 0), (0, o_pad - output_dim)))
    beta2 = jnp.pad(jnp.reshape(beta.astype(jnp.float32), (1, output_dim)),
                    ((0, 0), (0, o_pad - output_dim)))
    return {
        "w": w, "gamma": gamma2, "beta": beta2,
        "input_dim": input_dim, "output_dim": output_dim, "degree": dp1 - 1,
    }


def jacobi_kan_layer_with_norm(x, params, *, a=1.0, b=1.0, eps=1e-5,
                               batch_tile=2048, num_tensorcores=None,
                               return_padded=False):
    """Forward pass. x: any shape whose trailing dims flatten to (B, input_dim).

    return_padded=False -> returns (B, output_dim) (compact, minimal HBM write).
    return_padded=True  -> returns (B_pad, O_pad) lane-dense padded layout for a
                           downstream consumer; caller slices [:B, :output_dim]
                           lazily at the model boundary.
    """
    w, gamma2, beta2 = params["w"], params["gamma"], params["beta"]
    input_dim = params["input_dim"]
    output_dim = params["output_dim"]
    degree = params["degree"]
    k_dim, o_pad = w.shape
    assert k_dim == (degree + 1) * input_dim

    x2 = jnp.reshape(x, (-1, input_dim))   # bf16 input is fine; kernel upcasts
    B = x2.shape[0]

    # Batch tile: big (amortize ~0.35us/step pipeline overhead), multiple of 8
    # sublanes, clamped to the (8-rounded) batch.
    tb = max(8, (min(int(batch_tile), _ceil_to(B, 8)) // 8) * 8)
    # Split the grid across TensorCores only where it helps (v7x / megacore);
    # on single-TC v5e/v6e a forced >=2-step grid is pure overhead.
    n_tc = _num_tensorcores() if num_tensorcores is None else int(num_tensorcores)
    if n_tc > 1 and -(-B // tb) < n_tc and B > 8 * n_tc:
        tb = max(8, _ceil_to(-(-B // n_tc), 8))
    b_pad = _ceil_to(B, tb)
    if b_pad != B:
        x2 = jnp.pad(x2, ((0, b_pad - B), (0, 0)))

    o_cols = o_pad if return_padded else output_dim

    kernel = functools.partial(
        _jacobi_kan_kernel, degree=degree, a=float(a), b=float(b),
        eps=float(eps), out_true=output_dim)

    # Grid-invariant operands (constant index_map) are not re-DMA'd per step; if
    # VMEM ever gets tight (very large layers / tb=4096 on v7x's 64 MiB) add
    # pipeline_mode=pl.Buffered(1) to the w/gamma/beta specs and a second
    # "parallel" grid axis over o_pad.
    out = pl.pallas_call(
        kernel,
        out_shape=jax.ShapeDtypeStruct((b_pad, o_cols), x2.dtype),
        grid_spec=pltpu.PrefetchScalarGridSpec(
            num_scalar_prefetch=0,
            grid=(b_pad // tb,),
            in_specs=[
                pl.BlockSpec((tb, input_dim), lambda i: (i, 0)),
                pl.BlockSpec((k_dim, o_pad), lambda i: (0, 0)),
                pl.BlockSpec((1, o_pad), lambda i: (0, 0)),
                pl.BlockSpec((1, o_pad), lambda i: (0, 0)),
            ],
            out_specs=pl.BlockSpec((tb, o_cols), lambda i: (i, 0)),
        ),
        compiler_params=pltpu.CompilerParams(
            dimension_semantics=("parallel",)),
    )(x2, w, gamma2, beta2)

    if return_padded:
        return out           # caller slices [:B, :output_dim] lazily
    return out if b_pad == B else out[:B]


def _reference(x, jacobi_coeffs, gamma, beta, *, degree, a, b, eps=1e-5,
               matmul_dtype=jnp.float32):
    """Pure-JAX reference mirroring the PyTorch module.  `matmul_dtype` lets the
    test quantize the matmul operands like the kernel's MXU path (bf16)."""
    input_dim = jacobi_coeffs.shape[0]
    x2 = jnp.reshape(x, (-1, input_dim)).astype(jnp.float32)
    xt = jnp.tanh(x2)
    polys = [jnp.ones_like(xt)]
    if degree > 0:
        polys.append((a - b + (a + b + 2.0) * xt) / 2.0)
    for i in range(2, degree + 1):
        theta_k = (2 * i + a + b) * (2 * i + a + b - 1) / (2 * i * (i + a + b))
        theta_k1 = ((2 * i + a + b - 1) * (a * a - b * b)
                    / (2 * i * (i + a + b) * (2 * i + a + b - 2)))
        theta_k2 = ((i + a - 1) * (i + b - 1) * (2 * i + a + b)
                    / (i * (i + a + b) * (2 * i + a + b - 2)))
        polys.append((theta_k * xt + theta_k1) * polys[i - 1] - theta_k2 * polys[i - 2])
    jac = jnp.stack(polys, axis=-1)                              # (B, I, D+1)
    jac = jac.astype(matmul_dtype).astype(jnp.float32)
    coeffs = jacobi_coeffs.astype(matmul_dtype).astype(jnp.float32)
    y = jnp.einsum('bid,iod->bo', jac, coeffs)
    mean = jnp.mean(y, axis=-1, keepdims=True)
    var = jnp.mean((y - mean) ** 2, axis=-1, keepdims=True)
    return (y - mean) / jnp.sqrt(var + eps) * gamma + beta


if __name__ == "__main__":
    key = jax.random.PRNGKey(0)
    input_dim, output_dim, degree = 32, 32, 3
    a_par, b_par = 1.0, 1.0

    k_x, k_c = jax.random.split(key)
    # x flattens to (4*16, 32) = (64, 32) rows of input_dim features.
    x = jax.random.normal(k_x, (4, 16, input_dim), dtype=jnp.float32)

    # Deterministic parameter init mirroring the PyTorch module.
    std = 1.0 / (input_dim * (degree + 1))
    jacobi_coeffs = std * jax.random.normal(
        k_c, (input_dim, output_dim, degree + 1), dtype=jnp.float32)
    gamma = jnp.ones((output_dim,), dtype=jnp.float32)   # nn.LayerNorm default weight
    beta = jnp.zeros((output_dim,), dtype=jnp.float32)   # nn.LayerNorm default bias

    # One-time weight packing (bf16 coefficients -> native MXU path).
    params = prepare_jacobi_kan_params(jacobi_coeffs, gamma, beta)

    out = jacobi_kan_layer_with_norm(x, params, a=a_par, b=b_par)
    out = jax.block_until_ready(out)

    # Reference with bf16-quantized matmul operands (same as the kernel's MXU
    # inputs; accumulation is f32 in both), so only accumulation-order /
    # LayerNorm-pass differences remain.
    ref = _reference(x, jacobi_coeffs, gamma, beta, degree=degree,
                     a=a_par, b=b_par, matmul_dtype=jnp.bfloat16)
    assert out.shape == (64, output_dim)
    err = float(jnp.max(jnp.abs(out - ref)))
    assert jnp.allclose(out, ref, atol=2e-3, rtol=2e-3), f"max abs err {err}"

    print("KERNEL_OK")
</pallas_src>

<mosaic_0001>
module attributes {stable_mosaic.version = 11 : i64} {
  func.func @_jacobi_kan_kernel(%arg0: i32, %arg1: memref<64x32xf32, #tpu.memory_space<vmem>>, %arg2: memref<128x128xbf16, #tpu.memory_space<vmem>>, %arg3: memref<1x128xf32, #tpu.memory_space<vmem>>, %arg4: memref<1x128xf32, #tpu.memory_space<vmem>>, %arg5: memref<64x32xf32, #tpu.memory_space<vmem>>) attributes {dimension_semantics = [#tpu.dimension_semantics<parallel>], iteration_bounds = array<i64: 1>, scalar_prefetch = 0 : i64, scratch_operands = 0 : i64, tpu.core_type = #tpu.core_type<tc>, window_params = [{transform_indices = @transform_0, window_bounds = array<i64: 64, 32>}, {pipeline_mode = #tpu.pipeline_mode<synchronous>, transform_indices = @transform_1, window_bounds = array<i64: 128, 128>}, {pipeline_mode = #tpu.pipeline_mode<synchronous>, transform_indices = @transform_2, window_bounds = array<i64: 1, 128>}, {pipeline_mode = #tpu.pipeline_mode<synchronous>, transform_indices = @transform_3, window_bounds = array<i64: 1, 128>}, {transform_indices = @transform_4, window_bounds = array<i64: 64, 32>}]} {
    %c0 = arith.constant 0 : index
    %c0_0 = arith.constant 0 : index
    %0 = vector.load %arg1[%c0, %c0_0] : memref<64x32xf32, #tpu.memory_space<vmem>>, vector<64x32xf32>
    %1 = math.tanh %0 : vector<64x32xf32>
    %cst = arith.constant 1.000000e+00 : f32
    %2 = vector.broadcast %cst : f32 to vector<64x32xf32>
    %cst_1 = arith.constant 4.000000e+00 : f32
    %3 = vector.broadcast %cst_1 : f32 to vector<64x32xf32>
    %4 = arith.mulf %3, %1 : vector<64x32xf32>
    %cst_2 = arith.constant 0.000000e+00 : f32
    %5 = vector.broadcast %cst_2 : f32 to vector<64x32xf32>
    %6 = arith.addf %5, %4 : vector<64x32xf32>
    %cst_3 = arith.constant 5.000000e-01 : f32
    %7 = vector.broadcast %cst_3 : f32 to vector<64x32xf32>
    %8 = arith.mulf %6, %7 : vector<64x32xf32>
    %cst_4 = arith.constant 1.875000e+00 : f32
    %9 = vector.broadcast %cst_4 : f32 to vector<64x32xf32>
    %10 = arith.mulf %9, %1 : vector<64x32xf32>
    %cst_5 = arith.constant 0.000000e+00 : f32
    %11 = vector.broadcast %cst_5 : f32 to vector<64x32xf32>
    %12 = arith.addf %10, %11 : vector<64x32xf32>
    %13 = arith.mulf %12, %8 : vector<64x32xf32>
    %cst_6 = arith.constant 7.500000e-01 : f32
    %14 = vector.broadcast %cst_6 : f32 to vector<64x32xf32>
    %15 = arith.mulf %14, %2 : vector<64x32xf32>
    %16 = arith.subf %13, %15 : vector<64x32xf32>
    %cst_7 = arith.constant 1.86666667 : f32
    %17 = vector.broadcast %cst_7 : f32 to vector<64x32xf32>
    %18 = arith.mulf %17, %1 : vector<64x32xf32>
    %cst_8 = arith.constant 0.000000e+00 : f32
    %19 = vector.broadcast %cst_8 : f32 to vector<64x32xf32>
    %20 = arith.addf %18, %19 : vector<64x32xf32>
    %21 = arith.mulf %20, %16 : vector<64x32xf32>
    %cst_9 = arith.constant 8.000000e-01 : f32
    %22 = vector.broadcast %cst_9 : f32 to vector<64x32xf32>
    %23 = arith.mulf %22, %8 : vector<64x32xf32>
    %24 = arith.subf %21, %23 : vector<64x32xf32>
    %25 = tpu.concatenate %2, %8, %16, %24 in 1 : vector<64x32xf32>, vector<64x32xf32>, vector<64x32xf32>, vector<64x32xf32> -> vector<64x128xf32>
    %26 = arith.truncf %25 : vector<64x128xf32> to vector<64x128xbf16>
    %c0_10 = arith.constant 0 : index
    %c0_11 = arith.constant 0 : index
    %27 = vector.load %arg2[%c0_10, %c0_11] : memref<128x128xbf16, #tpu.memory_space<vmem>>, vector<128x128xbf16>
    %cst_12 = arith.constant dense<0.000000e+00> : vector<64x128xf32>
    %28 = tpu.matmul %26, %27, %cst_12 {dimension_numbers = #tpu.dot_dimension_numbers<[1], [0], [0], [1], [0, 0, 1, 1], [], []>} : vector<64x128xbf16>, vector<128x128xbf16>, vector<64x128xf32> -> vector<64x128xf32>
    %cst_13 = arith.constant dense<0.000000e+00> : vector<64xf32>
    %29 = vector.multi_reduction <add>, %28, %cst_13 [1] : vector<64x128xf32> to vector<64xf32>
    %30 = vector.shape_cast %29 : vector<64xf32> to vector<64x1xf32>
    %31 = arith.mulf %28, %28 : vector<64x128xf32>
    %cst_14 = arith.constant dense<0.000000e+00> : vector<64xf32>
    %32 = vector.multi_reduction <add>, %31, %cst_14 [1] : vector<64x128xf32> to vector<64xf32>
    %33 = vector.shape_cast %32 : vector<64xf32> to vector<64x1xf32>
    %cst_15 = arith.constant 3.125000e-02 : f32
    %34 = vector.broadcast %cst_15 : f32 to vector<64x1xf32>
    %35 = arith.mulf %30, %34 : vector<64x1xf32>
    %cst_16 = arith.constant 3.125000e-02 : f32
    %36 = vector.broadcast %cst_16 : f32 to vector<64x1xf32>
    %37 = arith.mulf %33, %36 : vector<64x1xf32>
    %38 = arith.mulf %35, %35 : vector<64x1xf32>
    %39 = arith.subf %37, %38 : vector<64x1xf32>
    %cst_17 = arith.constant 0.000000e+00 : f32
    %40 = vector.broadcast %cst_17 : f32 to vector<64x1xf32>
    %41 = arith.maximumf %39, %40 : vector<64x1xf32>
    %42 = vector.broadcast %35 : vector<64x1xf32> to vector<64x128xf32>
    %43 = arith.subf %28, %42 : vector<64x128xf32>
    %cst_18 = arith.constant 9.99999974E-6 : f32
    %44 = vector.broadcast %cst_18 : f32 to vector<64x1xf32>
    %45 = arith.addf %41, %44 : vector<64x1xf32>
    %46 = math.rsqrt %45 : vector<64x1xf32>
    %47 = vector.broadcast %46 : vector<64x1xf32> to vector<64x128xf32>
    %48 = arith.mulf %43, %47 : vector<64x128xf32>
    %c0_19 = arith.constant 0 : index
    %c0_20 = arith.constant 0 : index
    %49 = vector.load %arg3[%c0_19, %c0_20] : memref<1x128xf32, #tpu.memory_space<vmem>>, vector<1x128xf32>
    %50 = vector.broadcast %49 : vector<1x128xf32> to vector<64x128xf32>
    %51 = arith.mulf %48, %50 : vector<64x128xf32>
    %c0_21 = arith.constant 0 : index
    %c0_22 = arith.constant 0 : index
    %52 = vector.load %arg4[%c0_21, %c0_22] : memref<1x128xf32, #tpu.memory_space<vmem>>, vector<1x128xf32>
    %53 = vector.broadcast %52 : vector<1x128xf32> to vector<64x128xf32>
    %54 = arith.addf %51, %53 : vector<64x128xf32>
    %55 = vector.extract_strided_slice %54 {offsets = [0, 0], sizes = [64, 32], strides = [1, 1]} : vector<64x128xf32> to vector<64x32xf32>
    %c0_23 = arith.constant 0 : index
    %c0_24 = arith.constant 0 : index
    %56 = vector.load %arg5[%c0_23, %c0_24] : memref<64x32xf32, #tpu.memory_space<vmem>>, vector<64x32xf32>
    tpu.vector_store %arg5[%c0_23, %c0_24], %55 {strides = array<i32>} : memref<64x32xf32, #tpu.memory_space<vmem>>, vector<64x32xf32>,
    return
  }
  func.func @transform_0(%arg0: i32) -> (i32, i32) {
    %c0_i32 = arith.constant 0 : i32
    %c0_i32_0 = arith.constant 0 : i32
    return %arg0, %c0_i32 : i32, i32
  }
  func.func @transform_1(%arg0: i32) -> (i32, i32) {
    %c0_i32 = arith.constant 0 : i32
    %c0_i32_0 = arith.constant 0 : i32
    %c0_i32_1 = arith.constant 0 : i32
    return %c0_i32, %c0_i32_0 : i32, i32
  }
  func.func @transform_2(%arg0: i32) -> (i32, i32) {
    %c0_i32 = arith.constant 0 : i32
    %c0_i32_0 = arith.constant 0 : i32
    %c0_i32_1 = arith.constant 0 : i32
    return %c0_i32, %c0_i32_0 : i32, i32
  }
  func.func @transform_3(%arg0: i32) -> (i32, i32) {
    %c0_i32 = arith.constant 0 : i32
    %c0_i32_0 = arith.constant 0 : i32
    %c0_i32_1 = arith.constant 0 : i32
    return %c0_i32, %c0_i32_0 : i32, i32
  }
  func.func @transform_4(%arg0: i32) -> (i32, i32) {
    %c0_i32 = arith.constant 0 : i32
    %c0_i32_0 = arith.constant 0 : i32
    return %arg0, %c0_i32 : i32, i32
  }
}

</mosaic_0001>

<bundles_post_ra>
// kernel: tpu_custom_call.1
= control target key start
LH: loop header
LB: loop body
LE: loop exit
PB: predicated region body
PF: predicated region fallthrough
CT: control target
= control target key end

     0   :  { %s713_s14 = smov 32   ;;  %s714_s21 = smov 64   ;;  %vm226_vm0 = vcmask 261120   ;;  %vm235_vm1 = vcmask 523264   ;;  %vm244_vm2 = vcmask 785408   ;;  %s975_s0 = inlined_call_operand.vmem [shape: f32[64,32], index: 0, kind: input, shape index: {}]   ;;  %s976_s1 = inlined_call_operand.vmem [shape: bf16[128,128], index: 1, kind: input, shape index: {}]   ;;  %s977_s2 = inlined_call_operand.vmem [shape: f32[1,128], index: 2, kind: input, shape index: {}]   ;;  %s978_s3 = inlined_call_operand.vmem [shape: f32[1,128], index: 3, kind: input, shape index: {}]   ;;  %s979_s4 = inlined_call_operand.vmem [shape: f32[64,32], index: 4, kind: output, shape index: {}]  }
   0x1   :  { %v20_v0 = vld [vmem:[%s975_s0 + $0x10] sm:$0xff]  ;;  %v21_v1 = vld [vmem:[%s975_s0 + $0x18] sm:$0xff]  ;;  %v18_v2 = vld [vmem:[%s975_s0] sm:$0xff] }
   0x2   :  { %681 = vtanh.f32 %v20_v0  ;;  %v19_v3 = vld [vmem:[%s975_s0 + $0x8] sm:$0xff]  ;;  %v24_v4 = vld [vmem:[%s975_s0 + $0x30] sm:$0xff]  ;;  %v25_v5 = vld [vmem:[%s975_s0 + $0x38] sm:$0xff] }
   0x3   :  { %683 = vtanh.f32 %v21_v1  ;;  %v22_v6 = vld [vmem:[%s975_s0 + $0x20] sm:$0xff]  ;;  %v23_v7 = vld [vmem:[%s975_s0 + $0x28] sm:$0xff]  ;;  %v673_v8 = vld [vmem:[%s976_s1 + $0x38] sm:$0xff]  }
   0x4   :  { %685 = vtanh.f32 %v18_v2  ;;  %v674_v9 = vld [vmem:[%s976_s1 + $0x30] sm:$0xff]   ;;  %570 = vmatprep.subr.bf16.mxu0 %v673_v8  ;;  %594 = vmatprep.subr.bf16.mxu1 %v673_v8  ;;  %v675_v10 = vld [vmem:[%s976_s1 + $0x28] sm:$0xff]   ;;  %v676_v12 = vld [vmem:[%s976_s1 + $0x20] sm:$0xff]  }
   0x5   :  { %687 = vtanh.f32 %v19_v3  ;;  %571 = vmatpush3.bf16.msra.mxu0 %v673_v8  ;;  %602 = vmatpush3.bf16.msra.mxu1 %v673_v8  ;;  %v677_v31 = vld [vmem:[%s976_s1 + $0x18] sm:$0xff]   ;;  %v678_v51 = vld [vmem:[%s976_s1 + $0x10] sm:$0xff]  }
   0x6   :  { %689 = vtanh.f32 %v24_v4  ;;  %572 = vmatprep.subr.bf16.mxu0 %v674_v9  ;;  %595 = vmatprep.subr.bf16.mxu1 %v674_v9  ;;  %v679_v4 = vld [vmem:[%s976_s1 + $0x8] sm:$0xff]  }
   0x7   :  { %691 = vtanh.f32 %v25_v5 }
   0x8   :  { %693 = vtanh.f32 %v22_v6 }
   0x9   :  { %695 = vtanh.f32 %v23_v7  ;;  %573 = vmatpush3.bf16.msra.mxu0 %v674_v9  ;;  %603 = vmatpush3.bf16.msra.mxu1 %v674_v9 }
   0xa   :  { %574 = vmatprep.subr.bf16.mxu0 %v675_v10  ;;  %596 = vmatprep.subr.bf16.mxu1 %v675_v10 }
   0xd   :  { %575 = vmatpush3.bf16.msra.mxu0 %v675_v10  ;;  %604 = vmatpush3.bf16.msra.mxu1 %v675_v10 }
   0xe   :  { %576 = vmatprep.subr.bf16.mxu0 %v676_v12  ;;  %597 = vmatprep.subr.bf16.mxu1 %v676_v12 }
   0xf   :  { %v682_v11 = vpop.eup %681 }
  0x10   :  { %v684_v13 = vpop.eup %683  ;;  %v36_v14 = vmul.f32 4.0, %v682_v11  ;;  %v60_v15 = vmul.f32 1.875, %v682_v11  ;;  %v777_v19 = vmul.f32 1.8666667, %v682_v11 }
  0x11   :  { %v686_v16 = vpop.eup %685  ;;  %v37_v17 = vmul.f32 4.0, %v684_v13  ;;  %v61_v18 = vmul.f32 1.875, %v684_v13  ;;  %v779_v20 = vmul.f32 1.8666667, %v684_v13  ;;  %577 = vmatpush3.bf16.msra.mxu0 %v676_v12  ;;  %605 = vmatpush3.bf16.msra.mxu1 %v676_v12 }
  0x12   :  { %v688_v21 = vpop.eup %687  ;;  %v781_v22 = vmul.f32 0.5, %v36_v14  ;;  %v34_v23 = vmul.f32 4.0, %v686_v16  ;;  %v58_v24 = vmul.f32 1.875, %v686_v16  ;;  %v783_v25 = vmul.f32 1.8666667, %v686_v16  ;;  %578 = vmatprep.subr.bf16.mxu0 %v677_v31  ;;  %598 = vmatprep.subr.bf16.mxu1 %v677_v31 }
  0x13   :  { %v785_v26 = vpop.eup %689  ;;  %v787_v27 = vmul.f32 0.5, %v37_v17  ;;  %v35_v28 = vmul.f32 4.0, %v688_v21  ;;  %v59_v29 = vmul.f32 1.875, %v688_v21  ;;  %v789_v30 = vmul.f32 1.8666667, %v688_v21 }
  0x14   :  { %v794_v32 = vpop.eup %691  ;;  %v796_v33 = vmul.f32 0.5, %v34_v23  ;;  %v40_v34 = vmul.f32 4.0, %v785_v26  ;;  %v64_v35 = vmul.f32 1.875, %v785_v26  ;;  %v76_v36 = vmul.f32 %v60_v15, %v781_v22 }
  0x15   :  { %v694_v37 = vpop.eup %693  ;;  %v623_v38 = vpack.i.bf16 %v787_v27, %v781_v22  ;;  %v51_v39 = vmul.f32 0.5, %v35_v28  ;;  %v41_v40 = vmul.f32 4.0, %v794_v32  ;;  %v65_v41 = vmul.f32 1.875, %v794_v32  ;;  %579 = vmatpush3.bf16.msra.mxu0 %v677_v31  ;;  %606 = vmatpush3.bf16.msra.mxu1 %v677_v31 }
  0x16   :  { %v696_v42 = vpop.eup %695  ;;  %v56_v43 = vmul.f32 0.5, %v40_v34  ;;  %v38_v44 = vmul.f32 4.0, %v694_v37  ;;  %v62_v45 = vmul.f32 1.875, %v694_v37  ;;  %v74_v46 = vmul.f32 %v58_v24, %v796_v33  ;;  %580 = vmatprep.subr.bf16.mxu0 %v678_v51  ;;  %599 = vmatprep.subr.bf16.mxu1 %v678_v51  ;;  %v680_v24 = vld [vmem:[%s976_s1] sm:$0xff]   ;;  %s715_s1 = smov 96  }
  0x17   :  { %624 = vrot.lane.b32.xlu1 %v623_v38, %s713_s14  ;;  %v613_v47 = vpack.i.bf16 %v51_v39, %v796_v33  ;;  %v57_v48 = vmul.f32 0.5, %v41_v40  ;;  %v39_v49 = vmul.f32 4.0, %v696_v42  ;;  %v63_v50 = vmul.f32 1.875, %v696_v42 }
  0x18   :  { %v54_v52 = vmul.f32 0.5, %v38_v44  ;;  %v75_v53 = vmul.f32 %v59_v29, %v51_v39  ;;  %v540_v54 = vadd.f32 -0.75, %v74_v46  ;;  %v80_v55 = vmul.f32 %v64_v35, %v56_v43 }
  0x19   :  { %614 = vrot.lane.b32.xlu0 %v613_v47, %s713_s14  ;;  %v628_v56 = vpack.i.bf16 %v57_v48, %v56_v43  ;;  %v55_v57 = vmul.f32 0.5, %v39_v49  ;;  %v81_v58 = vmul.f32 %v65_v41, %v57_v48  ;;  %v77_v59 = vmul.f32 %v61_v18, %v787_v27  ;;  %581 = vmatpush3.bf16.msra.mxu0 %v678_v51 }
  0x1a   :  { %v78_v60 = vmul.f32 %v62_v45, %v54_v52  ;;  %v541_v61 = vadd.f32 -0.75, %v75_v53  ;;  %v546_v62 = vadd.f32 -0.75, %v80_v55  ;;  %v542_v63 = vadd.f32 -0.75, %v76_v36  ;;  %607 = vmatpush3.bf16.msra.mxu1 %v678_v51  ;;  %582 = vmatprep.subr.bf16.mxu0 %v679_v4 }
  0x1b   :  { %629 = vrot.lane.b32.xlu1 %v628_v56, %s713_s14  ;;  %v618_v0 = vpack.i.bf16 %v55_v57, %v54_v52  ;;  %v79_v1 = vmul.f32 %v63_v50, %v55_v57  ;;  %v547_v2 = vadd.f32 -0.75, %v81_v58  ;;  %v543_v3 = vadd.f32 -0.75, %v77_v59  ;;  %600 = vmatprep.subr.bf16.mxu1 %v679_v4 }
  0x1c   :  { %v544_v5 = vadd.f32 -0.75, %v78_v60  ;;  %v633_v6 = vpack.i.bf16 %v541_v61, %v540_v54  ;;  %v94_v7 = vmul.f32 1.8666667, %v694_v37  ;;  %v95_v8 = vmul.f32 1.8666667, %v696_v42 }
  0x1d   :  { %619 = vrot.lane.b32.xlu0 %v618_v0, %s713_s14  ;;  %v545_v9 = vadd.f32 -0.75, %v79_v1  ;;  %v648_v10 = vpack.i.bf16 %v547_v2, %v546_v62  ;;  %v643_v11 = vpack.i.bf16 %v543_v3, %v542_v63  ;;  %v118_v12 = vmul.f32 0.8, %v54_v52  ;;  %583 = vmatpush3.bf16.msra.mxu0 %v679_v4 }
  0x1e   :  { %v110_v13 = vmul.f32 %v544_v5, %v94_v7  ;;  %v119_v14 = vmul.f32 0.8, %v55_v57  ;;  %v106_v15 = vmul.f32 %v540_v54, %v783_v25  ;;  %v107_v16 = vmul.f32 %v541_v61, %v789_v30  ;;  %608 = vmatpush3.bf16.msra.mxu1 %v679_v4  ;;  %584 = vmatprep.subr.bf16.mxu0 %v680_v24 }
  0x1f   :  { %v638_v17 = vpack.i.bf16 %v545_v9, %v544_v5  ;;  %v111_v18 = vmul.f32 %v545_v9, %v95_v8  ;;  %v114_v21 = vmul.f32 0.8, %v796_v33  ;;  %v115_v23 = vmul.f32 0.8, %v51_v39  ;;  %601 = vmatprep.subr.bf16.mxu1 %v680_v24 }
  0x20   :  { %v126_v28 = vsub.f32 %v110_v13, %v118_v12  ;;  %v96_v29 = vmul.f32 1.8666667, %v785_v26  ;;  %v97_v31 = vmul.f32 1.8666667, %v794_v32  ;;  %v120_v34 = vmul.f32 0.8, %v56_v43 }
  0x21   :  { %639 = vrot.lane.b32.xlu1 %v638_v17, %s714_s21  ;;  %634 = vrot.lane.b32.xlu0 %v633_v6, %s714_s21  ;;  %v127_v25 = vsub.f32 %v111_v18, %v119_v14  ;;  %v122_v30 = vsub.f32 %v106_v15, %v114_v21  ;;  %v123_v35 = vsub.f32 %v107_v16, %v115_v23  ;;  %v121_v33 = vmul.f32 0.8, %v57_v48 }
  0x22   :  { %v112_v36 = vmul.f32 %v546_v62, %v96_v29  ;;  %v113_v37 = vmul.f32 %v547_v2, %v97_v31  ;;  %v108_v38 = vmul.f32 %v542_v63, %v777_v19  ;;  %v109_v39 = vmul.f32 %v543_v3, %v779_v20  ;;  %585 = vmatpush3.bf16.msra.mxu0 %v680_v24 }
  0x23   :  { %v116_v26 = vmul.f32 0.8, %v781_v22  ;;  %v117_v32 = vmul.f32 0.8, %v787_v27  ;;  %v658_v40 = vpack.i.bf16 %v127_v25, %v126_v28  ;;  %v653_v41 = vpack.i.bf16 %v123_v35, %v122_v30  ;;  %609 = vmatpush3.bf16.msra.mxu1 %v680_v24 }
  0x24   :  { %v128_v42 = vsub.f32 %v112_v36, %v120_v34  ;;  %v129_v43 = vsub.f32 %v113_v37, %v121_v33 }
  0x25   :  { %649 = vrot.lane.b32.xlu1 %v648_v10, %s714_s21  ;;  %644 = vrot.lane.b32.xlu0 %v643_v11, %s714_s21  ;;  %v124_v44 = vsub.f32 %v108_v38, %v116_v26  ;;  %v125_v45 = vsub.f32 %v109_v39, %v117_v32 }
  0x26   :  { %v668_v19 = vpack.i.bf16 %v129_v43, %v128_v42 }
  0x27   :  { %v663_v20 = vpack.i.bf16 %v125_v45, %v124_v44 }
  0x29   :  { %659 = vrot.lane.b32.xlu1 %v658_v40, %s715_s1  ;;  %654 = vrot.lane.b32.xlu0 %v653_v41, %s715_s1 }
  0x2d   :  { %669 = vrot.lane.b32.xlu1 %v668_v19, %s715_s1  ;;  %664 = vrot.lane.b32.xlu0 %v663_v20, %s715_s1 }
  0x89   :  { %v625_v22 = vpop.permute.xlu1 %624 }
  0x8a   :  { %v627_v50 = vunpack.i.h.bf16 %v625_v22  ;;  %v626_v62 = vunpack.i.l.bf16 %v625_v22 }
  0x8b   :  { %v615_v27 = vpop.permute.xlu0 %614 }
  0x8c   :  { %v617_v51 = vunpack.i.h.bf16 %v615_v27  ;;  %v616_v52 = vunpack.i.l.bf16 %v615_v27  ;;  %v230_v63 = vsel %vm226_vm0, 1.0, %v627_v50  ;;  %v229_v34 = vsel %vm226_vm0, 1.0, %v626_v62 }
  0x8d   :  { %v630_v46 = vpop.permute.xlu1 %629 }
  0x8e   :  { %v632_v53 = vunpack.i.h.bf16 %v630_v46  ;;  %v631_v54 = vunpack.i.l.bf16 %v630_v46  ;;  %v228_v0 = vsel %vm226_vm0, 1.0, %v617_v51  ;;  %v227_v1 = vsel %vm226_vm0, 1.0, %v616_v52 }
  0x8f   :  { %v620_v47 = vpop.permute.xlu0 %619 }
  0x90   :  { %v622_v55 = vunpack.i.h.bf16 %v620_v47  ;;  %v621_v56 = vunpack.i.l.bf16 %v620_v47  ;;  %v234_v3 = vsel %vm226_vm0, 1.0, %v632_v53  ;;  %v233_v4 = vsel %vm226_vm0, 1.0, %v631_v54 }
  0x92   :  { %v232_v5 = vsel %vm226_vm0, 1.0, %v622_v55  ;;  %v231_v6 = vsel %vm226_vm0, 1.0, %v621_v56 }
  0x93   :  { %v640_v48 = vpop.permute.xlu1 %639  ;;  %v635_v49 = vpop.permute.xlu0 %634 }
  0x94   :  { %v641_v57 = vunpack.i.l.bf16 %v640_v48  ;;  %v637_v58 = vunpack.i.h.bf16 %v635_v49  ;;  %v636_v59 = vunpack.i.l.bf16 %v635_v49  ;;  %v642_v2 = vunpack.i.h.bf16 %v640_v48 }
  0x96   :  { %v236_v10 = vsel %vm235_vm1, %v227_v1, %v636_v59  ;;  %v237_v11 = vsel %vm235_vm1, %v228_v0, %v637_v58  ;;  %v240_v12 = vsel %vm235_vm1, %v231_v6, %v641_v57  ;;  %v241_v23 = vsel %vm235_vm1, %v232_v5, %v642_v2 }
  0x97   :  { %v650_v60 = vpop.permute.xlu1 %649  ;;  %v645_v61 = vpop.permute.xlu0 %644 }
  0x98   :  { %v651_v7 = vunpack.i.l.bf16 %v650_v60  ;;  %v652_v17 = vunpack.i.h.bf16 %v650_v60  ;;  %v647_v18 = vunpack.i.h.bf16 %v645_v61  ;;  %v646_v21 = vunpack.i.l.bf16 %v645_v61 }
  0x9a   :  { %v242_v25 = vsel %vm235_vm1, %v233_v4, %v651_v7  ;;  %v243_v32 = vsel %vm235_vm1, %v234_v3, %v652_v17  ;;  %v239_v40 = vsel %vm235_vm1, %v230_v63, %v647_v18  ;;  %v238_v41 = vsel %vm235_vm1, %v229_v34, %v646_v21 }
  0x9b   :  { %v660_v8 = vpop.permute.xlu1 %659  ;;  %v655_v9 = vpop.permute.xlu0 %654 }
  0x9c   :  { %v662_v13 = vunpack.i.h.bf16 %v660_v8  ;;  %v661_v14 = vunpack.i.l.bf16 %v660_v8  ;;  %v657_v15 = vunpack.i.h.bf16 %v655_v9  ;;  %v656_v16 = vunpack.i.l.bf16 %v655_v9 }
  0x9e   :  { %v245_v24 = vsel %vm244_vm2, %v236_v10, %v656_v16  ;;  %v246_v28 = vsel %vm244_vm2, %v237_v11, %v657_v15  ;;  %v249_v29 = vsel %vm244_vm2, %v240_v12, %v661_v14  ;;  %v250_v31 = vsel %vm244_vm2, %v241_v23, %v662_v13 }
  0x9f   :  { %v670_v30 = vpop.permute.xlu1 %669  ;;  %v665_v35 = vpop.permute.xlu0 %664  ;;  %v253_v33 = vpack.c.bf16 %v246_v28, %v245_v24  ;;  %v255_v36 = vpack.c.bf16 %v250_v31, %v249_v29 }
  0xa0   :  { %v672_v37 = vunpack.i.h.bf16 %v670_v30  ;;  %v671_v38 = vunpack.i.l.bf16 %v670_v30  ;;  %v667_v39 = vunpack.i.h.bf16 %v665_v35  ;;  %v666_v26 = vunpack.i.l.bf16 %v665_v35 }
  0xa1   :  { %586 = vmatprep.mubr.bf16.mxu0 %v253_v33  ;;  %590 = vmatprep.mubr.bf16.mxu1 %v255_v36 }
  0xa2   :  { %v247_v42 = vsel %vm244_vm2, %v238_v41, %v666_v26  ;;  %v248_v43 = vsel %vm244_vm2, %v239_v40, %v667_v39  ;;  %v251_v44 = vsel %vm244_vm2, %v242_v25, %v671_v38  ;;  %v252_v45 = vsel %vm244_vm2, %v243_v32, %v672_v37 }
  0xa3   :  { %v254_v19 = vpack.c.bf16 %v248_v43, %v247_v42  ;;  %v256_v20 = vpack.c.bf16 %v252_v45, %v251_v44 }
  0xa5   :  { %587 = vmatmul.mubr.bf16.vlgmr.msra.gmra.mxu0 %v254_v19  ;;  %591 = vmatmul.mubr.bf16.vlgmr.msra.gmra.mxu1 %v256_v20 }
 0x165   :  { %v854_v22 = vpop.f32.mrf.mxu0  ;;  %v856_v27 = vpop.f32.mrf.mxu1 }
 0x166   :  { %398 = vadd.xlane.f32.xlu1 %v856_v27  ;;  %390 = vadd.xlane.f32.xlu0 %v854_v22  ;;  %v404_v48 = vmul.f32 %v854_v22, %v854_v22  ;;  %v408_v56 = vmul.f32 %v856_v27, %v856_v27 }
 0x167   :  { %v860_v46 = vpop.f32.mrf.mxu0  ;;  %v862_v47 = vpop.f32.mrf.mxu1 }
 0x168   :  { %v402_v50 = vmul.f32 %v860_v46, %v860_v46  ;;  %v406_v52 = vmul.f32 %v862_v47, %v862_v47 }
 0x169   :  { %v868_v49 = vpop.f32.mrf.mxu0  ;;  %v873_v51 = vpop.f32.mrf.mxu1 }
 0x16a   :  { %394 = vadd.xlane.f32.xlu1 %v862_v47  ;;  %386 = vadd.xlane.f32.xlu0 %v860_v46  ;;  %v405_v54 = vmul.f32 %v868_v49, %v868_v49  ;;  %v409_v59 = vmul.f32 %v873_v51, %v873_v51 }
 0x16b   :  { %v878_v53 = vpop.f32.mrf.mxu1  ;;  %v883_v55 = vpop.f32.mrf.mxu0 }
 0x16c   :  { %v403_v57 = vmul.f32 %v883_v55, %v883_v55  ;;  %v407_v58 = vmul.f32 %v878_v53, %v878_v53 }
 0x16e   :  { %414 = vadd.xlane.f32.xlu1 %v404_v48  ;;  %392 = vadd.xlane.f32.xlu0 %v868_v49 }
 0x172   :  { %410 = vadd.xlane.f32.xlu1 %v402_v50  ;;  %400 = vadd.xlane.f32.xlu0 %v873_v51 }
 0x176   :  { %418 = vadd.xlane.f32.xlu1 %v406_v52  ;;  %396 = vadd.xlane.f32.xlu0 %v878_v53 }
 0x17a   :  { %416 = vadd.xlane.f32.xlu0 %v405_v54  ;;  %388 = vadd.xlane.f32.xlu1 %v883_v55 }
 0x17e   :  { %422 = vadd.xlane.f32.xlu1 %v408_v56  ;;  %412 = vadd.xlane.f32.xlu0 %v403_v57 }
 0x182   :  { %420 = vadd.xlane.f32.xlu0 %v407_v58 }
 0x186   :  { %424 = vadd.xlane.f32.xlu0 %v409_v59  ;;  %v556_v59 = vld [vmem:[%s977_s2] ss:$0 sm:$0xff] }
 0x1ef   :  { %v399_v60 = vpop.xlane.xlu1 %398  ;;  %v391_v61 = vpop.xlane.xlu0 %390 }
 0x1f0   :  { %v428_v0 = vmul.f32 0.03125, %v391_v61  ;;  %v904_v29 = vmul.f32 0.03125, %v399_v60 }
 0x1f2   :  { %v444_v3 = vmul.f32 %v428_v0, %v428_v0  ;;  %v448_v38 = vmul.f32 %v904_v29, %v904_v29  ;;  %v468_v20 = vsub.f32 %v854_v22, %v428_v0  ;;  %v557_v0 = vld [vmem:[%s978_s3] ss:$0 sm:$0xff] }
 0x1f3   :  { %v395_v62 = vpop.xlane.xlu1 %394  ;;  %v387_v63 = vpop.xlane.xlu0 %386 }
 0x1f4   :  { %v894_v4 = vmul.f32 0.03125, %v387_v63  ;;  %v896_v9 = vmul.f32 0.03125, %v395_v62 }
 0x1f6   :  { %v442_v10 = vmul.f32 %v894_v4, %v894_v4  ;;  %v446_v18 = vmul.f32 %v896_v9, %v896_v9  ;;  %v466_v22 = vsub.f32 %v860_v46, %v894_v4  ;;  %v470_v46 = vsub.f32 %v862_v47, %v896_v9 }
 0x1f7   :  { %v415_v1 = vpop.xlane.xlu1 %414  ;;  %v393_v2 = vpop.xlane.xlu0 %392 }
 0x1f8   :  { %v436_v5 = vmul.f32 0.03125, %v415_v1  ;;  %v900_v15 = vmul.f32 0.03125, %v393_v2 }
 0x1fa   :  { %v452_v6 = vsub.f32 %v436_v5, %v444_v3  ;;  %v445_v31 = vmul.f32 %v900_v15, %v900_v15 }
 0x1fb   :  { %v411_v7 = vpop.xlane.xlu1 %410  ;;  %v401_v8 = vpop.xlane.xlu0 %400 }
 0x1fc   :  { %v460_v11 = vmax.f32 %v452_v6, 0.0  ;;  %v434_v12 = vmul.f32 0.03125, %v411_v7  ;;  %v917_v48 = vmul.f32 0.03125, %v401_v8 }
 0x1fe   :  { %v476_v13 = vadd.f32 1e-05, %v460_v11  ;;  %v450_v14 = vsub.f32 %v434_v12, %v442_v10  ;;  %v449_v1 = vmul.f32 %v917_v48, %v917_v48 }
 0x1ff   :  { %v419_v16 = vpop.xlane.xlu1 %418  ;;  %v397_v17 = vpop.xlane.xlu0 %396 }
 0x200   :  { %697 = vrsqrt.f32 %v476_v13  ;;  %v458_v21 = vmax.f32 %v450_v14, 0.0  ;;  %v438_v23 = vmul.f32 0.03125, %v419_v16  ;;  %v912_v39 = vmul.f32 0.03125, %v397_v17 }
 0x202   :  { %v474_v24 = vadd.f32 1e-05, %v458_v21  ;;  %v454_v28 = vsub.f32 %v438_v23, %v446_v18  ;;  %v447_v50 = vmul.f32 %v912_v39, %v912_v39  ;;  %v469_v21 = vsub.f32 %v868_v49, %v900_v15 }
 0x203   :  { %v417_v34 = vpop.xlane.xlu0 %416  ;;  %v389_v25 = vpop.xlane.xlu1 %388 }
 0x204   :  { %699 = vrsqrt.f32 %v474_v24  ;;  %v462_v30 = vmax.f32 %v454_v28, 0.0  ;;  %v437_v35 = vmul.f32 0.03125, %v417_v34  ;;  %v908_v33 = vmul.f32 0.03125, %v389_v25 }
 0x205   :  { %v472_v28 = vsub.f32 %v856_v27, %v904_v29 }
 0x206   :  { %v478_v36 = vadd.f32 1e-05, %v462_v30  ;;  %v453_v37 = vsub.f32 %v437_v35, %v445_v31  ;;  %v443_v26 = vmul.f32 %v908_v33, %v908_v33  ;;  %v467_v15 = vsub.f32 %v883_v55, %v908_v33 }
 0x207   :  { %v423_v32 = vpop.xlane.xlu1 %422  ;;  %v413_v40 = vpop.xlane.xlu0 %412  ;;  %v473_v55 = vsub.f32 %v873_v51, %v917_v48 }
 0x208   :  { %701 = vrsqrt.f32 %v478_v36  ;;  %v461_v41 = vmax.f32 %v453_v37, 0.0  ;;  %v440_v42 = vmul.f32 0.03125, %v423_v32  ;;  %v435_v43 = vmul.f32 0.03125, %v413_v40 }
 0x209   :  { %v471_v36 = vsub.f32 %v878_v53, %v912_v39 }
 0x20a   :  { %v477_v44 = vadd.f32 1e-05, %v461_v41  ;;  %v456_v45 = vsub.f32 %v440_v42, %v448_v38  ;;  %v451_v19 = vsub.f32 %v435_v43, %v443_v26 }
 0x20b   :  { %v421_v52 = vpop.xlane.xlu0 %420 }
 0x20c   :  { %703 = vrsqrt.f32 %v477_v44  ;;  %v464_v54 = vmax.f32 %v456_v45, 0.0  ;;  %v459_v56 = vmax.f32 %v451_v19, 0.0  ;;  %v439_v57 = vmul.f32 0.03125, %v421_v52 }
 0x20d   :  { %v698_v58 = vpop.eup %697 }
 0x20e   :  { %v492_v60 = vmul.f32 %v698_v58, %v468_v20  ;;  %v480_v61 = vadd.f32 1e-05, %v464_v54  ;;  %v475_v62 = vadd.f32 1e-05, %v459_v56  ;;  %v455_v63 = vsub.f32 %v439_v57, %v447_v50 }
 0x20f   :  { %v425_v2 = vpop.xlane.xlu0 %424 }
 0x210   :  { %v507_v3 = vmul.f32 %v556_v59, %v492_v60  ;;  %705 = vrsqrt.f32 %v480_v61  ;;  %v463_v5 = vmax.f32 %v455_v63, 0.0  ;;  %v441_v6 = vmul.f32 0.03125, %v425_v2 }
 0x211   :  { %v700_v7 = vpop.eup %699  ;;  %707 = vrsqrt.f32 %v475_v62 }
 0x212   :  { %v522_v8 = vadd.f32 %v557_v0, %v507_v3  ;;  %v490_v10 = vmul.f32 %v700_v7, %v466_v22  ;;  %v479_v11 = vadd.f32 1e-05, %v463_v5  ;;  %v457_v12 = vsub.f32 %v441_v6, %v449_v1 }
 0x214   :  { %530 = vst.msk [vmem:[%s979_s4 + $0x10] sm:$0xff] %vm226_vm0, %v522_v8  ;;  %v505_v4 = vmul.f32 %v556_v59, %v490_v10  ;;  %709 = vrsqrt.f32 %v479_v11  ;;  %v465_v13 = vmax.f32 %v457_v12, 0.0 }
 0x215   :  { %v702_v14 = vpop.eup %701 }
 0x216   :  { %v520_v16 = vadd.f32 %v557_v0, %v505_v4  ;;  %v494_v17 = vmul.f32 %v702_v14, %v470_v46  ;;  %v481_v18 = vadd.f32 1e-05, %v465_v13 }
 0x218   :  { %528 = vst.msk [vmem:[%s979_s4] sm:$0xff] %vm226_vm0, %v520_v16  ;;  %v509_v47 = vmul.f32 %v556_v59, %v494_v17  ;;  %711 = vrsqrt.f32 %v481_v18 }
 0x219   :  { %v704_v9 = vpop.eup %703 }
 0x21a   :  { %v524_v23 = vadd.f32 %v557_v0, %v509_v47  ;;  %v493_v24 = vmul.f32 %v704_v9, %v469_v21 }
 0x21c   :  { %532 = vst.msk [vmem:[%s979_s4 + $0x20] sm:$0xff] %vm226_vm0, %v524_v23  ;;  %v508_v31 = vmul.f32 %v556_v59, %v493_v24 }
 0x21d   :  { %v706_v49 = vpop.eup %705 }
 0x21e   :  { %v708_v34 = vpop.eup %707  ;;  %v523_v25 = vadd.f32 %v557_v0, %v508_v31  ;;  %v496_v30 = vmul.f32 %v706_v49, %v472_v28 }
 0x21f   :  { %v491_v35 = vmul.f32 %v708_v34, %v467_v15 }
 0x220   :  { %531 = vst.msk [vmem:[%s979_s4 + $0x18] sm:$0xff] %vm226_vm0, %v523_v25  ;;  %v511_v27 = vmul.f32 %v556_v59, %v496_v30 }
 0x221   :  { %v710_v29 = vpop.eup %709  ;;  %v506_v37 = vmul.f32 %v556_v59, %v491_v35 }
 0x222   :  { %v526_v38 = vadd.f32 %v557_v0, %v511_v27  ;;  %v495_v26 = vmul.f32 %v710_v29, %v471_v36 }
 0x223   :  { %v521_v32 = vadd.f32 %v557_v0, %v506_v37 }
 0x224   :  { %534 = vst.msk [vmem:[%s979_s4 + $0x30] sm:$0xff] %vm226_vm0, %v526_v38  ;;  %v510_v53 = vmul.f32 %v556_v59, %v495_v26 }
 0x225   :  { %v712_v33 = vpop.eup %711  ;;  %529 = vst.msk [vmem:[%s979_s4 + $0x8] sm:$0xff] %vm226_vm0, %v521_v32 }
 0x226   :  { %v525_v39 = vadd.f32 %v557_v0, %v510_v53  ;;  %v497_v40 = vmul.f32 %v712_v33, %v473_v55 }
 0x228   :  { %533 = vst.msk [vmem:[%s979_s4 + $0x28] sm:$0xff] %vm226_vm0, %v525_v39  ;;  %v512_v51 = vmul.f32 %v556_v59, %v497_v40 }
 0x22a   :  { %v527_v41 = vadd.f32 %v557_v0, %v512_v51 }
 0x22c   :  { %535 = vst.msk [vmem:[%s979_s4 + $0x38] sm:$0xff] %vm226_vm0, %v527_v41 }

</bundles_post_ra>
